<compile_context>
chip_gen: v6e
topology: v6e:2x2x1
jax: 0.10.0
libtpu: 0.0.40
codegen_flags: <defaults>
</compile_context>

<pallas_src>
import functools
import math

import jax
import jax.numpy as jnp
from jax.experimental import pallas as pl
from jax.experimental.pallas import tpu as pltpu


# ------------------------------- helpers -------------------------------------
def _round_up(x, m):
    return ((x + m - 1) // m) * m


def _act(name, x):
    if name == "gelu":
        return jax.nn.gelu(x, approximate=True)
    if name == "relu":
        return jnp.maximum(x, 0.0)
    raise ValueError(name)


def _vmem_budget_bytes():
    """~75% of per-core VMEM (leaves headroom for compiler scratch)."""
    try:
        cap = pltpu.get_tpu_info().vmem_capacity_bytes
        return int(cap * 3 // 4)
    except Exception:
        return 64 * 1024 * 1024  # conservative fallback; fine for small shapes


def _vmem_resident(tm, D, H):
    """Rough per-step VMEM footprint of the weights-resident path (bytes)."""
    return (2 * D * H * 2 +          # W1 + W2 bf16, single copy (resident)
            2 * (H + D) * 4 +        # biases f32
            2 * tm * D * 2 +         # x tile bf16, double-buffered
            2 * tm * D * 4 +         # out tile (<= f32), double-buffered
            tm * H * 6)              # hidden intermediate (f32 + bf16 copy)


def _vmem_tiled(tm, th, D):
    """Rough per-step VMEM footprint of the hidden-tiled path (bytes)."""
    return (2 * 2 * D * th * 2 +     # W1/W2 tiles bf16, double-buffered
            2 * (th + D) * 4 +       # bias tiles
            2 * tm * D * 2 +         # x tile bf16, double-buffered
            2 * tm * D * 4 +         # out tile, double-buffered
            tm * D * 4 +             # f32 accumulator scratch
            tm * th * 6)             # hidden intermediate (f32 + bf16 copy)


# ------------------------------ kernels ---------------------------------------
def _ffn_resident_kernel(x_ref, w1_ref, b1_ref, w2_ref, b2_ref, o_ref, *, act2):
    """Whole FFN for one M tile; W1/W2 stay resident in VMEM across the grid."""
    h = jnp.dot(x_ref[...], w1_ref[...], preferred_element_type=jnp.float32)
    h = jnp.maximum(h + b1_ref[...], 0.0)                       # f32 epilogue
    # Dropout: identity (inference).
    y = jnp.dot(h.astype(w2_ref.dtype), w2_ref[...],
                preferred_element_type=jnp.float32)
    y = y + b2_ref[...]
    o_ref[...] = _act(act2, y).astype(o_ref.dtype)


def _ffn_tiled_kernel(x_ref, w1_ref, b1_ref, w2_ref, b2_ref, o_ref, acc_ref, *, act2):
    """Grid (M_tiles, H_tiles); hidden axis is the innermost reduction axis."""
    j = pl.program_id(1)

    h = jnp.dot(x_ref[...], w1_ref[...], preferred_element_type=jnp.float32)
    h = jnp.maximum(h + b1_ref[...], 0.0)                       # f32 epilogue
    # Dropout: identity (inference).
    part = jnp.dot(h.astype(w2_ref.dtype), w2_ref[...],
                   preferred_element_type=jnp.float32)

    @pl.when(j == 0)
    def _():
        acc_ref[...] = part + b2_ref[...]      # first partial + bias, no zero pass

    @pl.when(j > 0)
    def _():
        acc_ref[...] += part

    @pl.when(j == pl.num_programs(1) - 1)
    def _():
        o_ref[...] = _act(act2, acc_ref[...]).astype(o_ref.dtype)


# ------------------------------- wrapper --------------------------------------
def feed_forward(x, w1, b1, w2, b2, *, act2="gelu", tm_target=512, th_target=512,
                 weights_resident=None):
    """x: (..., D); w1: (D, 4D); b1: (4D,); w2: (4D, D); b2: (D,)."""
    orig_shape = x.shape
    orig_dtype = x.dtype
    D = orig_shape[-1]
    M = math.prod(orig_shape[:-1])
    H = w1.shape[1]

    # bf16 matmul operands, f32 accumulation.
    xm = x.reshape(M, D).astype(jnp.bfloat16)
    w1 = w1.astype(jnp.bfloat16)
    w2 = w2.astype(jnp.bfloat16)
    b1 = b1.reshape(1, H).astype(jnp.float32)
    b2 = b2.reshape(1, D).astype(jnp.float32)

    budget = _vmem_budget_bytes()

    # M tile: as large as the budget allows (weight re-streaming scales ~ 1/tm).
    tm = min(tm_target, _round_up(M, 8))
    tm = max(8, (tm // 8) * 8)

    use_resident = weights_resident
    if use_resident is None:
        use_resident = _vmem_resident(tm, D, H) <= (budget * 2) // 3

    out_itemsize = jnp.dtype(orig_dtype).itemsize
    flops = 4 * M * D * H
    bytes_accessed = int(M * D * 2 + 4 * D * H + (H + D) * 4 + M * D * out_itemsize)
    cost = pl.CostEstimate(flops=int(flops), transcendentals=int(M * D),
                           bytes_accessed=bytes_accessed)

    if use_resident:
        # ---------------- weights-resident path: grid = (M_tiles,) -----------
        while tm > 8 and _vmem_resident(tm, D, H) > (budget * 2) // 3:
            tm = max(8, (tm // 2 // 8) * 8)
        Mp = _round_up(M, tm)
        xp = jnp.pad(xm, ((0, Mp - M), (0, 0))) if Mp != M else xm

        out = pl.pallas_call(
            functools.partial(_ffn_resident_kernel, act2=act2),
            out_shape=jax.ShapeDtypeStruct((Mp, D), orig_dtype),
            grid=(Mp // tm,),
            in_specs=[
                pl.BlockSpec((tm, D), lambda i: (i, 0)),   # x tile
                pl.BlockSpec((D, H), lambda i: (0, 0)),    # W1 (resident)
                pl.BlockSpec((1, H), lambda i: (0, 0)),    # b1
                pl.BlockSpec((H, D), lambda i: (0, 0)),    # W2 (resident)
                pl.BlockSpec((1, D), lambda i: (0, 0)),    # b2
            ],
            out_specs=pl.BlockSpec((tm, D), lambda i: (i, 0)),
            compiler_params=pltpu.CompilerParams(
                dimension_semantics=("parallel",),
                vmem_limit_bytes=budget),
            cost_estimate=cost,
        )(xp, w1, b1, w2, b2)
        return out[:M].reshape(orig_shape)

    # ---------------- hidden-tiled path: grid = (M_tiles, H_tiles) -----------
    th = min(th_target, _round_up(H, 128))
    th = max(128, (th // 128) * 128)
    while _vmem_tiled(tm, th, D) > (budget * 3) // 4 and (tm > 8 or th > 128):
        if th > 128:
            th = max(128, (th // 2 // 128) * 128)
        else:
            tm = max(8, (tm // 2 // 8) * 8)

    Mp = _round_up(M, tm)
    Hp = _round_up(H, th)
    xp = jnp.pad(xm, ((0, Mp - M), (0, 0))) if Mp != M else xm
    if Hp != H:
        # Zero-padded hidden units contribute relu(0 + 0) @ 0 == 0: exact no-op.
        w1 = jnp.pad(w1, ((0, 0), (0, Hp - H)))
        b1 = jnp.pad(b1, ((0, 0), (0, Hp - H)))
        w2 = jnp.pad(w2, ((0, Hp - H), (0, 0)))

    out = pl.pallas_call(
        functools.partial(_ffn_tiled_kernel, act2=act2),
        out_shape=jax.ShapeDtypeStruct((Mp, D), orig_dtype),
        grid=(Mp // tm, Hp // th),
        in_specs=[
            pl.BlockSpec((tm, D), lambda i, j: (i, 0)),    # x tile
            pl.BlockSpec((D, th), lambda i, j: (0, j)),    # W1 hidden-slice
            pl.BlockSpec((1, th), lambda i, j: (0, j)),    # b1 hidden-slice
            pl.BlockSpec((th, D), lambda i, j: (j, 0)),    # W2 hidden-slice
            pl.BlockSpec((1, D), lambda i, j: (0, 0)),     # b2 (full)
        ],
        out_specs=pl.BlockSpec((tm, D), lambda i, j: (i, 0)),
        scratch_shapes=[pltpu.VMEM((tm, D), jnp.float32)],
        compiler_params=pltpu.CompilerParams(
            dimension_semantics=("parallel", "arbitrary"),
            vmem_limit_bytes=budget),
        cost_estimate=cost,
    )(xp, w1, b1, w2, b2)
    return out[:M].reshape(orig_shape)


# ------------------------------ parameters ------------------------------------
def _xavier(key, fan_in, fan_out):
    limit = math.sqrt(6.0 / (fan_in + fan_out))
    return jax.random.uniform(key, (fan_in, fan_out), jnp.float32, -limit, limit)


def init_params(key, d_model):
    k1, k2 = jax.random.split(key, 2)
    hidden = d_model * 4
    return {
        "w1": _xavier(k1, d_model, hidden), "b1": jnp.zeros((hidden,), jnp.float32),
        "w2": _xavier(k2, hidden, d_model), "b2": jnp.zeros((d_model,), jnp.float32),
    }


# ------------------------- pure-JAX reference check ---------------------------
def _reference(params, x, act2="gelu"):
    h = jnp.maximum(x @ params["w1"] + params["b1"], 0.0)
    return _act(act2, h @ params["w2"] + params["b2"])


# ----------------------------------- main --------------------------------------
if __name__ == "__main__":
    root = jax.random.PRNGKey(0)
    # Tolerance is loosened vs. the f32 reference because matmul operands are bf16.
    TOL = dict(rtol=3e-2, atol=3e-2)

    # --- 1) module-consistent small shapes: batch=2, seq=8, d_model=32 -------
    B, S, D = 2, 8, 32
    kp, kx = jax.random.split(root, 2)
    params = init_params(kp, D)
    x = jax.random.normal(kx, (B, S, D), jnp.float32)
    out = feed_forward(x, params["w1"], params["b1"], params["w2"], params["b2"])
    out = jax.block_until_ready(out)
    ref = _reference(params, x)
    assert out.shape == (B, S, D)
    assert jnp.allclose(out, ref, **TOL)

    # --- 2) non-multiple-of-8 token count -> exercises M padding -------------
    x3 = jax.random.normal(jax.random.PRNGKey(2), (3, 5, D), jnp.float32)
    out3 = feed_forward(x3, params["w1"], params["b1"], params["w2"], params["b2"])
    out3 = jax.block_until_ready(out3)
    ref3 = _reference(params, x3)
    assert out3.shape == (3, 5, D)
    assert jnp.allclose(out3, ref3, **TOL)

    # --- 3) larger shapes forcing the hidden-tiled reduction path ------------
    B2, S2, D2 = 4, 64, 128
    kp2, kx2 = jax.random.split(jax.random.PRNGKey(1), 2)
    params2 = init_params(kp2, D2)
    x2 = jax.random.normal(kx2, (B2, S2, D2), jnp.float32)
    out2 = feed_forward(x2, params2["w1"], params2["b1"], params2["w2"],
                        params2["b2"], tm_target=128, th_target=256,
                        weights_resident=False)
    out2 = jax.block_until_ready(out2)
    ref2 = _reference(params2, x2)
    assert out2.shape == (B2, S2, D2)
    assert jnp.allclose(out2, ref2, **TOL)

    print("KERNEL_OK")
</pallas_src>

<mosaic_0001>
module attributes {stable_mosaic.version = 11 : i64} {
  func.func @_ffn_resident_kernel(%arg0: i32, %arg1: memref<16x32xbf16, #tpu.memory_space<vmem>>, %arg2: memref<32x128xbf16, #tpu.memory_space<vmem>>, %arg3: memref<1x128xf32, #tpu.memory_space<vmem>>, %arg4: memref<128x32xbf16, #tpu.memory_space<vmem>>, %arg5: memref<1x32xf32, #tpu.memory_space<vmem>>, %arg6: memref<16x32xf32, #tpu.memory_space<vmem>>) attributes {dimension_semantics = [#tpu.dimension_semantics<parallel>], iteration_bounds = array<i64: 1>, scalar_prefetch = 0 : i64, scratch_operands = 0 : i64, tpu.core_type = #tpu.core_type<tc>, window_params = [{transform_indices = @transform_0, window_bounds = array<i64: 16, 32>}, {pipeline_mode = #tpu.pipeline_mode<synchronous>, transform_indices = @transform_1, window_bounds = array<i64: 32, 128>}, {pipeline_mode = #tpu.pipeline_mode<synchronous>, transform_indices = @transform_2, window_bounds = array<i64: 1, 128>}, {pipeline_mode = #tpu.pipeline_mode<synchronous>, transform_indices = @transform_3, window_bounds = array<i64: 128, 32>}, {pipeline_mode = #tpu.pipeline_mode<synchronous>, transform_indices = @transform_4, window_bounds = array<i64: 1, 32>}, {transform_indices = @transform_5, window_bounds = array<i64: 16, 32>}]} {
    %c0 = arith.constant 0 : index
    %c0_0 = arith.constant 0 : index
    %0 = vector.load %arg1[%c0, %c0_0] : memref<16x32xbf16, #tpu.memory_space<vmem>>, vector<16x32xbf16>
    %c0_1 = arith.constant 0 : index
    %c0_2 = arith.constant 0 : index
    %1 = vector.load %arg2[%c0_1, %c0_2] : memref<32x128xbf16, #tpu.memory_space<vmem>>, vector<32x128xbf16>
    %cst = arith.constant dense<0.000000e+00> : vector<16x128xf32>
    %2 = tpu.matmul %0, %1, %cst {dimension_numbers = #tpu.dot_dimension_numbers<[1], [0], [0], [1], [0, 0, 1, 1], [], []>} : vector<16x32xbf16>, vector<32x128xbf16>, vector<16x128xf32> -> vector<16x128xf32>
    %c0_3 = arith.constant 0 : index
    %c0_4 = arith.constant 0 : index
    %3 = vector.load %arg3[%c0_3, %c0_4] : memref<1x128xf32, #tpu.memory_space<vmem>>, vector<1x128xf32>
    %4 = vector.broadcast %3 : vector<1x128xf32> to vector<16x128xf32>
    %5 = arith.addf %2, %4 : vector<16x128xf32>
    %cst_5 = arith.constant 0.000000e+00 : f32
    %6 = vector.broadcast %cst_5 : f32 to vector<16x128xf32>
    %7 = arith.maximumf %5, %6 : vector<16x128xf32>
    %8 = arith.truncf %7 : vector<16x128xf32> to vector<16x128xbf16>
    %c0_6 = arith.constant 0 : index
    %c0_7 = arith.constant 0 : index
    %9 = vector.load %arg4[%c0_6, %c0_7] : memref<128x32xbf16, #tpu.memory_space<vmem>>, vector<128x32xbf16>
    %cst_8 = arith.constant dense<0.000000e+00> : vector<16x32xf32>
    %10 = tpu.matmul %8, %9, %cst_8 {dimension_numbers = #tpu.dot_dimension_numbers<[1], [0], [0], [1], [0, 0, 1, 1], [], []>} : vector<16x128xbf16>, vector<128x32xbf16>, vector<16x32xf32> -> vector<16x32xf32>
    %c0_9 = arith.constant 0 : index
    %c0_10 = arith.constant 0 : index
    %11 = vector.load %arg5[%c0_9, %c0_10] : memref<1x32xf32, #tpu.memory_space<vmem>>, vector<1x32xf32>
    %12 = vector.broadcast %11 : vector<1x32xf32> to vector<16x32xf32>
    %13 = arith.addf %10, %12 : vector<16x32xf32>
    %14 = arith.mulf %13, %13 : vector<16x32xf32>
    %15 = arith.mulf %13, %14 : vector<16x32xf32>
    %cst_11 = arith.constant 4.471500e-02 : f32
    %16 = vector.broadcast %cst_11 : f32 to vector<16x32xf32>
    %17 = arith.mulf %16, %15 : vector<16x32xf32>
    %18 = arith.addf %13, %17 : vector<16x32xf32>
    %cst_12 = arith.constant 0.797884583 : f32
    %19 = vector.broadcast %cst_12 : f32 to vector<16x32xf32>
    %20 = arith.mulf %19, %18 : vector<16x32xf32>
    %21 = math.tanh %20 : vector<16x32xf32>
    %cst_13 = arith.constant 1.000000e+00 : f32
    %22 = vector.broadcast %cst_13 : f32 to vector<16x32xf32>
    %23 = arith.addf %22, %21 : vector<16x32xf32>
    %cst_14 = arith.constant 5.000000e-01 : f32
    %24 = vector.broadcast %cst_14 : f32 to vector<16x32xf32>
    %25 = arith.mulf %24, %23 : vector<16x32xf32>
    %26 = arith.mulf %13, %25 : vector<16x32xf32>
    %c0_15 = arith.constant 0 : index
    %c0_16 = arith.constant 0 : index
    %27 = vector.load %arg6[%c0_15, %c0_16] : memref<16x32xf32, #tpu.memory_space<vmem>>, vector<16x32xf32>
    tpu.vector_store %arg6[%c0_15, %c0_16], %26 {strides = array<i32>} : memref<16x32xf32, #tpu.memory_space<vmem>>, vector<16x32xf32>,
    return
  }
  func.func @transform_0(%arg0: i32) -> (i32, i32) {
    %c0_i32 = arith.constant 0 : i32
    %c0_i32_0 = arith.constant 0 : i32
    return %arg0, %c0_i32 : i32, i32
  }
  func.func @transform_1(%arg0: i32) -> (i32, i32) {
    %c0_i32 = arith.constant 0 : i32
    %c0_i32_0 = arith.constant 0 : i32
    %c0_i32_1 = arith.constant 0 : i32
    return %c0_i32, %c0_i32_0 : i32, i32
  }
  func.func @transform_2(%arg0: i32) -> (i32, i32) {
    %c0_i32 = arith.constant 0 : i32
    %c0_i32_0 = arith.constant 0 : i32
    %c0_i32_1 = arith.constant 0 : i32
    return %c0_i32, %c0_i32_0 : i32, i32
  }
  func.func @transform_3(%arg0: i32) -> (i32, i32) {
    %c0_i32 = arith.constant 0 : i32
    %c0_i32_0 = arith.constant 0 : i32
    %c0_i32_1 = arith.constant 0 : i32
    return %c0_i32, %c0_i32_0 : i32, i32
  }
  func.func @transform_4(%arg0: i32) -> (i32, i32) {
    %c0_i32 = arith.constant 0 : i32
    %c0_i32_0 = arith.constant 0 : i32
    %c0_i32_1 = arith.constant 0 : i32
    return %c0_i32, %c0_i32_0 : i32, i32
  }
  func.func @transform_5(%arg0: i32) -> (i32, i32) {
    %c0_i32 = arith.constant 0 : i32
    %c0_i32_0 = arith.constant 0 : i32
    return %arg0, %c0_i32 : i32, i32
  }
}

</mosaic_0001>

<bundles_post_ra>
// kernel: tpu_custom_call.1
= control target key start
LH: loop header
LB: loop body
LE: loop exit
PB: predicated region body
PF: predicated region fallthrough
CT: control target
= control target key end

     0   :  { %v344_v1 = vmov 0.0   ;;  %vm345_vm0 = vmmov 0   ;;  %vm52_vm1 = vcmask 261120   ;;  %s424_s0 = inlined_call_operand.vmem [shape: bf16[16,32], index: 0, kind: input, shape index: {}]   ;;  %s425_s1 = inlined_call_operand.vmem [shape: bf16[32,128], index: 1, kind: input, shape index: {}]   ;;  %s426_s2 = inlined_call_operand.vmem [shape: f32[1,128], index: 2, kind: input, shape index: {}]   ;;  %s427_s3 = inlined_call_operand.vmem [shape: bf16[128,32], index: 3, kind: input, shape index: {}]   ;;  %s428_s4 = inlined_call_operand.vmem [shape: f32[1,32], index: 4, kind: input, shape index: {}]   ;;  %s429_s5 = inlined_call_operand.hbm [shape: f32[16,32], index: 5, kind: output, shape index: {}]  }
   0x1   :  { %v307_v0 = vld [vmem:[%s425_s1 + $0x8] sm:$0xff]   ;;  %274 = vmatprep.subr.bf16.mxu0 %v344_v1  ;;  %282 = vmatprep.subr.bf16.mxu1 %v344_v1  ;;  %v308_v2 = vld [vmem:[%s425_s1] sm:$0xff]   ;;  %v310_v3 = vld [vmem:[%s427_s3 + $0x38] sm:$0xff]  }
   0x2   :  { %275 = vmatpush3.bf16.msra.mxu0 %v307_v0  ;;  %278 = vmatprep.mubr.msk.bf16.mxu0 %vm345_vm0, %v344_v1  ;;  %v309_v4 = vld [vmem:[%s424_s0] sm:$0xff]   ;;  %v311_v5 = vld [vmem:[%s427_s3 + $0x30] sm:$0xff]   ;;  %v312_v6 = vld [vmem:[%s427_s3 + $0x28] sm:$0xff]  }
   0x3   :  { %276 = vmatprep.subr.bf16.mxu0 %v344_v1  ;;  %298 = vmatprep.mubr.msk.bf16.mxu1 %vm345_vm0, %v344_v1 }
   0x4   :  { %283 = vmatpush3.bf16.msra.mxu1 %v310_v3 }
   0x5   :  { %284 = vmatprep.subr.bf16.mxu1 %v344_v1 }
   0x6   :  { %277 = vmatpush3.bf16.msra.mxu0 %v308_v2 }
   0x8   :  { %285 = vmatpush3.bf16.msra.mxu1 %v311_v5 }
   0x9   :  { %279 = vmatmul.mubr.msk.bf16.vlgmr.msra.gmra.mxu0 %vm52_vm1, %v309_v4  ;;  %286 = vmatprep.subr.bf16.mxu1 %v344_v1 }
   0xa   :  { %10 = vsyncpa [#allocation3], 0  ;;  %v313_v7 = vld [vmem:[%s427_s3 + $0x20] sm:$0xff]   ;;  %v314_v8 = vld [vmem:[%s427_s3 + $0x18] sm:$0xff]  }
   0xb   :  { %v315_v9 = vld [vmem:[%s427_s3 + $0x10] sm:$0xff]   ;;  %v316_v10 = vld [vmem:[%s427_s3 + $0x8] sm:$0xff]   ;;  %v317_v11 = vld [vmem:[%s427_s3] sm:$0xff]  }
   0xc   :  { %287 = vmatpush3.bf16.msra.mxu1 %v312_v6  ;;  %v248_v12 = vld [vmem:[%s426_s2] ss:$0 sm:$0xff]  ;;  %s346_s2 = smov [#allocation2]  }
   0xd   :  { %288 = vmatprep.subr.bf16.mxu1 %v344_v1  ;;  %v253_v22 = vld [vmem:[%s428_s4] ss:$0 sm:$0xff]  ;;  %s237_s3 = sshll.u32 %s346_s2, 4  ;;  %s238_s3 = int_to_ptr.vmem [resolvable:$true] %s237_s3 }
   0xe   :  { %s322_s4 = scalar_lea.vmem %s238_s3, 256  ;;  %p327_p1 = scmp.lt.s32.totalorder %s238_s3, %s238_s3 }
   0xf   :  { %p323_p0 = scmp.ne.s32.totalorder %s238_s3, %s322_s4  ;;  %p328_p2 = scmp.lt.s32.totalorder %s322_s4, %s322_s4 }
  0x10   :  { %289 = vmatpush3.bf16.msra.mxu1 %v313_v7 }
  0x11   :  { %290 = vmatprep.subr.bf16.mxu1 %v344_v1  ;;  %p329_p3 = por %p328_p2, %p327_p1 }
  0x13   :  { %p330_p4 = pnand %p329_p3, %p323_p0 }
  0x14   :  { %291 = vmatpush3.bf16.msra.mxu1 %v314_v8 }
  0x15   :  { %292 = vmatprep.subr.bf16.mxu1 %v344_v1 }
  0x18   :  { %293 = vmatpush3.bf16.msra.mxu1 %v315_v9 }
  0x19   :  { %294 = vmatprep.subr.bf16.mxu1 %v344_v1 }
  0x1c   :  { %295 = vmatpush3.bf16.msra.mxu1 %v316_v10 }
  0x1d   :  { %296 = vmatprep.subr.bf16.mxu1 %v344_v1 }
  0x20   :  { %297 = vmatpush3.bf16.msra.mxu1 %v317_v11 }
  0xc9   :  { %v90_v13 = vpop.f32.mrf.mxu0 }
  0xca   :  { %v91_v15 = vadd.f32 %v248_v12, %v90_v13 }
  0xcb   :  { %v280_v14 = vpop.f32.mrf.mxu0 }
  0xcc   :  { %v97_v19 = vmax.f32 %v91_v15, 0.0 }
  0xcd   :  { %v93_v16 = vpop.f32.mrf.mxu0 }
  0xce   :  { %v94_v17 = vadd.f32 %v248_v12, %v93_v16 }
  0xcf   :  { %v281_v18 = vpop.f32.mrf.mxu0 }
  0xd0   :  { %v98_v20 = vmax.f32 %v94_v17, 0.0 }
  0xd2   :  { %v99_v21 = vpack.c.bf16 %v98_v20, %v97_v19 }
  0xd4   :  { %299 = vmatmul.mubr.bf16.vlgmr.msra.gmra.mxu1 %v99_v21 }
 0x194   :  { %v205_v23 = vpop.f32.mrf.mxu1 }
 0x195   :  { %v206_v24 = vadd.f32 %v253_v22, %v205_v23 }
 0x196   :  { %v300_v25 = vpop.f32.mrf.mxu1 }
 0x197   :  { %v212_v26 = vmul.f32 %v206_v24, %v206_v24 }
 0x198   :  { %v208_v27 = vpop.f32.mrf.mxu1 }
 0x199   :  { %v214_v28 = vmul.f32 %v212_v26, %v206_v24  ;;  %v209_v29 = vadd.f32 %v253_v22, %v208_v27 }
 0x19a   :  { %v301_v30 = vpop.f32.mrf.mxu1 }
 0x19b   :  { %v216_v31 = vmul.f32 0.044715, %v214_v28  ;;  %v213_v32 = vmul.f32 %v209_v29, %v209_v29 }
 0x19d   :  { %v218_v33 = vadd.f32 %v216_v31, %v206_v24  ;;  %v215_v34 = vmul.f32 %v213_v32, %v209_v29 }
 0x19f   :  { %v220_v35 = vmul.f32 0.7978846, %v218_v33  ;;  %v217_v36 = vmul.f32 0.044715, %v215_v34 }
 0x1a1   :  { %318 = vtanh.f32 %v220_v35  ;;  %v219_v37 = vadd.f32 %v217_v36, %v209_v29 }
 0x1a3   :  { %v221_v38 = vmul.f32 0.7978846, %v219_v37 }
 0x1a5   :  { %320 = vtanh.f32 %v221_v38 }
 0x1ae   :  { %v319_v39 = vpop.eup %318 }
 0x1af   :  { %v224_v40 = vadd.f32 1.0, %v319_v39 }
 0x1b1   :  { %v226_v41 = vmul.f32 0.5, %v224_v40 }
 0x1b2   :  { %v321_v42 = vpop.eup %320 }
 0x1b3   :  { %v228_v43 = vmul.f32 %v226_v41, %v206_v24  ;;  %v225_v44 = vadd.f32 1.0, %v321_v42 }
 0x1b5   :  { %230 = vst.msk [vmem:[#allocation2] sm:$0xff] %vm52_vm1, %v228_v43  ;;  %v227_v45 = vmul.f32 0.5, %v225_v44 }
 0x1b7   :  { %v229_v46 = vmul.f32 %v227_v45, %v209_v29 }
 0x1b9   :  { %231 = vst.msk [vmem:[#allocation2 + $0x8] sm:$0xff] %vm52_vm1, %v229_v46 }
 0x1ba   :  { %333 = shalt.err (!%p330_p4)
}
 0x1bb   :  { %s347_s17 = smov 128   ;;  %s348_s18 = smov 8  }
 0x1bc   :  { %243 = dma.vmem_to_hbm [thread:$0]  %s238_s3, 256, %s429_s5, [#allocation3], %s347_s17, %s347_s17, %s348_s18  }
 0x1bd   :  { %342 = dma.done.wait [#allocation3], 256  }
 0x1be   :  { %343 = vsyncadd [#allocation3], 4294967040 }
 0x1bf   :  { %247 = vsyncpa [#allocation3], 1 }

</bundles_post_ra>
